<compile_context>
chip_gen: v6e
topology: v6e:2x2x1
jax: 0.10.0
libtpu: 0.0.40
codegen_flags: <defaults>
</compile_context>

<pallas_src>
import math

import jax
import jax.numpy as jnp
from jax.experimental import pallas as pl
from jax.experimental.pallas import tpu as pltpu


# -----------------------------------------------------------------------------
# Primary path: nn.Identity.forward(x) == x.  A trace-time no-op.
# -----------------------------------------------------------------------------
def identity(x: jax.Array) -> jax.Array:
    """torch.nn.Identity forward: returns x unchanged (zero cost, no kernel)."""
    # Per perf review: launching even an empty Pallas kernel costs ~1-3 us and,
    # without jit+donation, input_output_aliases forces a defensive full copy.
    # Returning x directly is strictly better whenever a Pallas fusion/ordering
    # boundary is not explicitly required.
    return x


# -----------------------------------------------------------------------------
# Secondary path: materialize a fresh copy of x through a Pallas kernel
# (useful when a new buffer / explicit Pallas boundary is required).
# Direct HBM->HBM chunked DMA: no VMEM staging, no vld/vst traffic, no
# per-generation tile tuning; runs at the HBM roofline on v5e/v6e/v7x.
# -----------------------------------------------------------------------------
_MAX_INFLIGHT_DMAS = 4          # small start-all / wait-all DMA fan-out
_MIN_CHUNK_BYTES = 1 << 20      # don't split copies into chunks under ~1 MiB


def _chunk_plan(n_rows: int, row_bytes: int):
    """Static (trace-time) plan: list of (start_row, num_rows) chunks."""
    if n_rows <= 1:
        return [(0, n_rows)] if n_rows else []
    total_bytes = n_rows * row_bytes
    n_chunks = min(
        _MAX_INFLIGHT_DMAS,
        n_rows,
        max(1, total_bytes // _MIN_CHUNK_BYTES),
    )
    rows_per = -(-n_rows // n_chunks)  # ceil div
    plan = []
    start = 0
    while start < n_rows:
        size = min(rows_per, n_rows - start)
        plan.append((start, size))
        start += size
    return plan  # len(plan) <= n_chunks <= _MAX_INFLIGHT_DMAS


def _dma_identity_kernel(x_ref, o_ref, sems):
    # x_ref / o_ref are raw HBM refs (memory_space=pl.ANY): no auto-DMA, no
    # VMEM staging.  All shapes below are static Python ints at trace time.
    n_rows = x_ref.shape[0]
    row_bytes = math.prod(x_ref.shape[1:]) * jnp.dtype(x_ref.dtype).itemsize
    plan = _chunk_plan(n_rows, row_bytes)

    if len(plan) <= 1:
        # Single contiguous DMA covering the whole array.
        cp = pltpu.make_async_copy(x_ref, o_ref, sems.at[0])
        cp.start()
        cp.wait()
        return

    # Several concurrent DMAs along the (contiguous) leading axis, each with
    # its own completion semaphore: start all, then wait all.  A pure copy has
    # nothing to overlap with compute, so this simple fan-out is enough to
    # keep the DMA engines busy.
    copies = []
    for idx, (start, size) in enumerate(plan):
        copies.append(
            pltpu.make_async_copy(
                x_ref.at[pl.ds(start, size)],
                o_ref.at[pl.ds(start, size)],
                sems.at[idx],
            )
        )
    for cp in copies:
        cp.start()
    for cp in copies:
        cp.wait()


def identity_materialize(x: jax.Array) -> jax.Array:
    """Identity that returns a freshly materialized copy via HBM->HBM DMA."""
    orig_shape = x.shape
    if x.ndim == 0:
        x = x.reshape(1)  # give the DMA chunker a leading axis
    out = pl.pallas_call(
        _dma_identity_kernel,
        out_shape=jax.ShapeDtypeStruct(x.shape, x.dtype),
        in_specs=[pl.BlockSpec(memory_space=pl.ANY)],   # stay in HBM
        out_specs=pl.BlockSpec(memory_space=pl.ANY),    # stay in HBM
        scratch_shapes=[pltpu.SemaphoreType.DMA((_MAX_INFLIGHT_DMAS,))],
    )(x)
    return out.reshape(orig_shape)


if __name__ == "__main__":
    key = jax.random.PRNGKey(0)
    x = jax.random.normal(key, (2, 4, 16, 16), dtype=jnp.float32)

    # 1) Module-faithful forward: true no-op (zero cost on every generation).
    y = identity(x)
    jax.block_until_ready(y)
    assert y.shape == x.shape and y.dtype == x.dtype
    assert bool(jnp.all(y == x))

    # 2) Pallas materializing copy: direct HBM->HBM chunked DMA.
    y_copy = identity_materialize(x)
    jax.block_until_ready(y_copy)
    assert y_copy.shape == x.shape and y_copy.dtype == x.dtype
    assert bool(jnp.all(y_copy == x))

    # 3) Irregular size (not a multiple of 128 elements) goes through the same
    #    DMA path — no VMEM tiling constraints to violate.
    x_odd = jax.random.normal(jax.random.PRNGKey(1), (3, 5, 7), dtype=jnp.float32)
    y_odd = identity_materialize(x_odd)
    jax.block_until_ready(y_odd)
    assert y_odd.shape == x_odd.shape and y_odd.dtype == x_odd.dtype
    assert bool(jnp.all(y_odd == x_odd))

    print("KERNEL_OK")
</pallas_src>

<mosaic_0001>
module attributes {stable_mosaic.version = 11 : i64} {
  func.func @_dma_identity_kernel(%arg0: memref<2x4x16x16xf32, #tpu.memory_space<any>>, %arg1: memref<2x4x16x16xf32, #tpu.memory_space<any>>, %arg2: memref<4x!tpu.dma_semaphore, #tpu.memory_space<semaphore_mem>>) attributes {dimension_semantics = [], scalar_prefetch = 0 : i64, scratch_operands = 1 : i64, tpu.core_type = #tpu.core_type<tc>} {
    %c0_i32 = arith.constant 0 : i32
    %0 = tpu.memref_slice %arg2[%c0_i32] : memref<4x!tpu.dma_semaphore, #tpu.memory_space<semaphore_mem>> -> memref<1x!tpu.dma_semaphore, #tpu.memory_space<semaphore_mem>>
    %1 = tpu.memref_squeeze %0 : memref<1x!tpu.dma_semaphore, #tpu.memory_space<semaphore_mem>> -> memref<!tpu.dma_semaphore, #tpu.memory_space<semaphore_mem>>
    tpu.enqueue_dma source(%arg0 : memref<2x4x16x16xf32, #tpu.memory_space<any>>) target(%arg1 : memref<2x4x16x16xf32, #tpu.memory_space<any>>) target_semaphore(%1 : memref<!tpu.dma_semaphore, #tpu.memory_space<semaphore_mem>>)
    %c0_i32_0 = arith.constant 0 : i32
    %2 = tpu.memref_slice %arg2[%c0_i32_0] : memref<4x!tpu.dma_semaphore, #tpu.memory_space<semaphore_mem>> -> memref<1x!tpu.dma_semaphore, #tpu.memory_space<semaphore_mem>>
    %3 = tpu.memref_squeeze %2 : memref<1x!tpu.dma_semaphore, #tpu.memory_space<semaphore_mem>> -> memref<!tpu.dma_semaphore, #tpu.memory_space<semaphore_mem>>
    tpu.wait_dma2 semaphore(%3 : memref<!tpu.dma_semaphore, #tpu.memory_space<semaphore_mem>>) src(%arg0 : memref<2x4x16x16xf32, #tpu.memory_space<any>>) dst(%arg1 : memref<2x4x16x16xf32, #tpu.memory_space<any>>)
    return
  }
}

</mosaic_0001>

<bundles_post_ra>
// kernel: tpu_custom_call.1
= control target key start
LH: loop header
LB: loop body
LE: loop exit
PB: predicated region body
PF: predicated region fallthrough
CT: control target
= control target key end

     0   :  { %s54_s6 = smov [#allocation2]   ;;  %s55_s7 = smov 131072   ;;  %s73_s0 = inlined_call_operand.hbm [shape: f32[2,4,16,16], index: 0, kind: input, shape index: {}]   ;;  %s74_s1 = inlined_call_operand.hbm [shape: f32[2,4,16,16], index: 1, kind: output, shape index: {}]  }
   0x1   :  { %s56_s8 = smov 0  }
   0x2   :  { %12 = dma.general %s73_s0, 2048, %s74_s1, %s54_s6, %s55_s7, [#allocation4], %s56_s8, 0  }
   0x3   :  { %52 = dma.done.wait [#allocation2], 2048 }
   0x4   :  { %53 = vsyncadd [#allocation2], 4294965248 }
   0x5   :  { %18 = vsyncmov [#allocation2] }
   0x8   :  { %s19_s13 = vpop.sfrf %18 }
   0x9   :  { %p45_p0 = scmp.ne.s32.totalorder %s19_s13, 0 }
   0xb   :  { %23 = shalt.err (%p45_p0)  }
   0xc   :  { %25 = vsyncmov [#allocation2 + $0x1] }
   0xf   :  { %s26_s14 = vpop.sfrf %25 }
  0x10   :  { %p46_p1 = scmp.ne.s32.totalorder %s26_s14, 0 }
  0x12   :  { %30 = shalt.err (%p46_p1)  }
  0x13   :  { %32 = vsyncmov [#allocation2 + $0x2] }
  0x16   :  { %s33_s15 = vpop.sfrf %32 }
  0x17   :  { %p47_p2 = scmp.ne.s32.totalorder %s33_s15, 0 }
  0x19   :  { %37 = shalt.err (%p47_p2)  }
  0x1a   :  { %39 = vsyncmov [#allocation2 + $0x3] }
  0x1d   :  { %s40_s16 = vpop.sfrf %39 }
  0x1e   :  { %p48_p3 = scmp.ne.s32.totalorder %s40_s16, 0 }
  0x20   :  { %44 = shalt.err (%p48_p3)  }

</bundles_post_ra>
